<compile_context>
chip_gen: v5e
topology: v5e:2x2
jax: 0.10.0
libtpu: 0.0.40
codegen_flags: <defaults>
</compile_context>

<pallas_src>
import functools

import jax
import jax.numpy as jnp
from jax.experimental import pallas as pl
from jax.experimental.pallas import tpu as pltpu

_LANE = 128
# ~3 MiB input blocks -> 12 MiB total double-buffered VMEM (in + out).
_TARGET_BLOCK_BYTES = 3 * 1024 * 1024
# Keep >= this many row-grid steps (when the tensor is big enough) so v7x's
# two TensorCores can each stream blocks.
_MIN_ROW_STEPS = 4


def _leaky_relu_kernel(x_ref, o_ref, *, negative_slope):
    x = x_ref[...]
    o_ref[...] = jnp.where(x >= 0, x, x * negative_slope)


def leaky_relu_pallas(
    x: jax.Array,
    negative_slope: float = 0.1,
    *,
    donate_input: bool = False,
) -> jax.Array:
    orig_shape = x.shape
    dtype = x.dtype
    n = x.size
    if n == 0:
        return x

    itemsize = jnp.dtype(dtype).itemsize
    # Native packed-tile sublane count: 8 (32-bit), 16 (16-bit), 32 (8-bit).
    min_sublane = max(8, 32 // max(itemsize, 1))

    # ---- Lane-dense 2D view: (rows, 128) -------------------------------------
    rows = pl.cdiv(n, _LANE)
    padded = (n % _LANE) != 0
    if padded:
        # No divisor of n can be a multiple of 128 when n % 128 != 0, so pay one
        # wrapper-side pad of the flat view rather than streaming with a narrow
        # lane dim (masked vst.msk / under-filled vregs on every block).
        flat = jnp.pad(x.reshape(-1), (0, rows * _LANE - n))
        x2d = flat.reshape(rows, _LANE)
    else:
        x2d = x.reshape(rows, _LANE)  # metadata-only reshape

    # ---- Row tiling -----------------------------------------------------------
    # Budget-derived rows per block (multiple of the packed sublane tile).
    budget_rows = _TARGET_BLOCK_BYTES // (_LANE * itemsize)
    budget_rows = max(min_sublane, (budget_rows // min_sublane) * min_sublane)

    if rows <= min_sublane:
        # Single full-extent block along rows (legal even if rows % 8 != 0).
        block_rows = rows
    else:
        # Cap so the row axis has >= _MIN_ROW_STEPS grid steps (megacore work on
        # v7x), but never below one packed sublane tile.
        cap = (pl.cdiv(rows, _MIN_ROW_STEPS) // min_sublane) * min_sublane
        cap = max(min_sublane, cap)
        block_rows = min(budget_rows, cap)

    grid = (pl.cdiv(rows, block_rows),)

    out2d = pl.pallas_call(
        functools.partial(_leaky_relu_kernel, negative_slope=negative_slope),
        out_shape=jax.ShapeDtypeStruct((rows, _LANE), dtype),
        grid_spec=pltpu.PrefetchScalarGridSpec(
            num_scalar_prefetch=0,
            grid=grid,
            in_specs=[pl.BlockSpec((block_rows, _LANE), lambda i: (i, 0))],
            out_specs=pl.BlockSpec((block_rows, _LANE), lambda i: (i, 0)),
        ),
        compiler_params=pltpu.CompilerParams(
            dimension_semantics=("parallel",),
        ),
        # Writes the result in-place into x's buffer when the caller can donate
        # it (saves a full-size HBM output allocation; zero effect on traffic).
        input_output_aliases=({0: 0} if donate_input else {}),
    )(x2d)

    if padded:
        return out2d.reshape(-1)[:n].reshape(orig_shape)
    return out2d.reshape(orig_shape)


if __name__ == "__main__":
    key = jax.random.PRNGKey(0)
    # Small NCHW activation tensor consistent with the module's forward.
    x = jax.random.normal(key, (2, 4, 16, 16), dtype=jnp.float32)

    negative_slope = 0.1
    y = leaky_relu_pallas(x, negative_slope=negative_slope)
    jax.block_until_ready(y)

    # Reference check in plain JAX (matches torch.nn.functional.leaky_relu).
    y_ref = jnp.where(x >= 0, x, x * negative_slope)
    assert y.shape == x.shape and y.dtype == x.dtype
    assert jnp.allclose(y, y_ref, atol=0.0, rtol=0.0), "mismatch vs reference"

    print("KERNEL_OK")
</pallas_src>

<mosaic_0001>
module attributes {stable_mosaic.version = 11 : i64} {
  func.func @_leaky_relu_kernel(%arg0: i32, %arg1: memref<8x128xf32, #tpu.memory_space<vmem>>, %arg2: memref<8x128xf32, #tpu.memory_space<vmem>>) attributes {dimension_semantics = [#tpu.dimension_semantics<parallel>], iteration_bounds = array<i64: 2>, scalar_prefetch = 0 : i64, scratch_operands = 0 : i64, tpu.core_type = #tpu.core_type<tc>, window_params = [{transform_indices = @transform_0, window_bounds = array<i64: 8, 128>}, {transform_indices = @transform_1, window_bounds = array<i64: 8, 128>}]} {
    %c0 = arith.constant 0 : index
    %c0_0 = arith.constant 0 : index
    %0 = vector.load %arg1[%c0, %c0_0] : memref<8x128xf32, #tpu.memory_space<vmem>>, vector<8x128xf32>
    %cst = arith.constant 0.000000e+00 : f32
    %1 = vector.broadcast %cst : f32 to vector<8x128xf32>
    %2 = arith.cmpf oge, %0, %1 : vector<8x128xf32>
    %cst_1 = arith.constant 1.000000e-01 : f32
    %3 = vector.broadcast %cst_1 : f32 to vector<8x128xf32>
    %4 = arith.mulf %0, %3 : vector<8x128xf32>
    %5 = arith.select %2, %0, %4 : vector<8x128xi1>, vector<8x128xf32>
    %c0_2 = arith.constant 0 : index
    %c0_3 = arith.constant 0 : index
    %6 = vector.load %arg2[%c0_2, %c0_3] : memref<8x128xf32, #tpu.memory_space<vmem>>, vector<8x128xf32>
    tpu.vector_store %arg2[%c0_2, %c0_3], %5 {strides = array<i32>} : memref<8x128xf32, #tpu.memory_space<vmem>>, vector<8x128xf32>,
    return
  }
  func.func @transform_0(%arg0: i32) -> (i32, i32) {
    %c0_i32 = arith.constant 0 : i32
    %c0_i32_0 = arith.constant 0 : i32
    return %arg0, %c0_i32 : i32, i32
  }
  func.func @transform_1(%arg0: i32) -> (i32, i32) {
    %c0_i32 = arith.constant 0 : i32
    %c0_i32_0 = arith.constant 0 : i32
    return %arg0, %c0_i32 : i32, i32
  }
}

</mosaic_0001>

<bundles_post_ra>
// kernel: tpu_custom_call.1
= control target key start
LH: loop header
LB: loop body
LE: loop exit
PB: predicated region body
PF: predicated region fallthrough
CT: control target
= control target key end

     0   :  { %6 = vsyncpa [#allocation3], 0  ;;  %s518_s0 = inlined_call_operand.hbm [shape: f32[16,128], index: 0, kind: input, shape index: {}]   ;;  %s519_s1 = inlined_call_operand.hbm [shape: f32[16,128], index: 1, kind: output, shape index: {}]  }
   0x1   :  { %8 = vsyncpa [#allocation3 + $0x1], 0 }
   0x2   :  { %9 = vsyncpa [#allocation4], 0 }
   0x3   :  { %11 = vsyncpa [#allocation4 + $0x1], 0  ;;  %s391_s6 = smov 0   ;;  %s393_s7 = smov 0  }
   0x4   :  { %s395_s8 = smov 0   ;;  %s397_s9 = smov 0  }
   0x5 LB: > { %s412_s10 = sadd.s32 4294967295, %s379_s9   ;;  %s225_s11 = sadd.s32 4294967294, %s379_s9   ;;  %s379_s9 = sphi %s397_s9, %s529_s9   ;;  %s375_s8 = sphi %s395_s8, %s528_s8   ;;  %s371_s7 = sphi %s393_s7, %s527_s7   ;;  %s367_s6 = sphi %s391_s6, %s526_s6  }
   0x6   : > { %s416_s12 = sadd.s32 1, %s379_s9   ;;  %s24_s13 = sadd.s32 1, %s375_s8 }
   0x7   : > { %s21_s14 = ssub.s32 %s379_s9, %s416_s12  ;;  %p31_p0 = scmp.ne.s32.totalorder %s375_s8, %s371_s7 }
   0x8   : > { %p22_p1 = scmp.eq.s32.totalorder %s21_s14, 0  ;;  %p32_p2 = scmp.eq.s32.totalorder %s379_s9, 0 }
   0x9   : > { %p37_p3 = scmp.ne.s32.totalorder %s371_s7, %s367_s6  ;;  %p38_p4 = scmp.eq.s32.totalorder %s412_s10, 0 }
   0xa   : > { %s428_s15 = scalar_select %p22_p1, %s375_s8, %s24_s13  }
   0xb   : > { %p430_p5 = por %p32_p2, %p31_p0  ;;  %p434_p6 = por %p38_p4, %p37_p3 }
   0xc   : > { %p61_p7 = scmp.eq.s32.totalorder %s412_s10, 1  ;;  %p67_p8 = scmp.eq.s32.totalorder %s225_s11, 1 }
   0xd   : > { %p249_p10 = scmp.lt.s32.totalorder %s379_s9, 2  ;;  %s87_s20 = sand.u32 1, %s375_s8  }
   0xe   : > { %p441_p11 = por %p61_p7, %p31_p0  ;;  %p445_p12 = por %p67_p8, %p37_p3 }
   0xf   : > { %s229_s21 = sshll.u32 %s379_s9, 3  ;;  %s228_s22 = sshll.u32 %s87_s20, 3 }
  0x10   : > { %s95_s25 = scalar_lea.hbm %s518_s0, %s229_s21  ;;  %s91_s27 = scalar_lea.vmem [#allocation2], %s228_s22 }
  0x11   : > { %s97_s26 = sshll.u32 %s95_s25, 4  ;;  %s99_s28 = sshll.u32 %s91_s27, 4  ;;  %s98_s26 = int_to_ptr.hbm [resolvable:$true] %s97_s26  ;;  %s100_s28 = int_to_ptr.vmem [resolvable:$true] %s99_s28 }
  0x12   : > { %p456_p13 = pnand %p249_p10, %p430_p5  ;;  %p230_p0 = scmp.ge.s32.totalorder %s379_s9, 1 }
  0x13   : > { %p104_p1 = scmp.lt.s32.totalorder %s379_s9, 3  ;;  %s88_s30 = scalar_lea.sflag [#allocation3], %s87_s20 }
  0x14   : > { %s283_s2 = sshra.s32 %s98_s26, 4  ;;  %p287_p3 = pneg %p456_p13  ;;  %s284_s2 = int_to_ptr.hbm [resolvable:$true] %s283_s2 }
  0x15   : > { %s285_s3 = scalar_lea.hbm %s284_s2, 8  ;;  %s290_s11 = scalar_lea.hbm %s518_s0, 16 }
  0x16   : > { %p286_p2 = scmp.ne.s32.totalorder %s284_s2, %s285_s3  ;;  %p291_p5 = scmp.lt.s32.totalorder %s284_s2, %s518_s0 }
  0x17   : > { %p292_p8 = scmp.lt.s32.totalorder %s290_s11, %s285_s3 }
  0x18   : > { %p288_p4 = pnand %p287_p3, %p286_p2 }
  0x19   : > { %p293_p10 = por %p292_p8, %p291_p5 }
  0x1a   : > { %p289_p7 = pneg %p288_p4 }
  0x1c   : > { %p294_p9 = pnand %p293_p10, %p289_p7 }
  0x1e   : > { %297 = shalt.err (!%p294_p9)
}
  0x1f   : > { %244 = dma.hbm_to_vmem [thread:$0]  (!%p456_p13), %s98_s26, 128, %s100_s28, %s88_s30  }
  0x20   : > { %p105_p2 = pnand %p230_p0, %p104_p1 }
  0x21   : > { %s477_s16 = sand.u32 (!%p105_p2), 1, %s371_s7  }
  0x22   : > { %108 = sbr.rel (%p105_p2) target bundleno = 55 (0x37), region = 24  ;;  %s231_s20 = sshll.u32 (!%p105_p2), %s477_s16, 3 }
  0x23   : > { %s111_s21 = scalar_lea.sflag (!%p105_p2), [#allocation3], %s477_s16  ;;  %s114_s22 = scalar_lea.vmem (!%p105_p2), [#allocation2], %s231_s20 }
  0x27   : > { %358 = dma.done.wait (%p434_p6), %s111_s21, 128  }
  0x28   : > { %360 = vsyncadd (%p434_p6), %s111_s21, 4294967168  ;;  %s234_s23 = sshll.u32 %s412_s10, 3  ;;  %s133_s27 = scalar_lea.vmem [#allocation5], %s231_s20  ;;  %v134_v0 = vld [vmem:[%s114_s22] sm:$0xff] }
  0x29   : > { %s150_s26 = scalar_lea.hbm %s519_s1, %s234_s23  ;;  %s152_s28 = sshll.u32 %s133_s27, 4  ;;  %vm135_vm0 = vcmp.ge.f32.partialorder %v134_v0, 0.0  ;;  %v136_v1 = vmul.f32 0.1, %v134_v0  ;;  %s153_s28 = int_to_ptr.vmem [resolvable:$true] %s152_s28 }
  0x2a   : > { %s154_s29 = sshll.u32 %s150_s26, 4  ;;  %s140_s17 = scalar_lea.sflag [#allocation4], %s477_s16  ;;  %s155_s29 = int_to_ptr.hbm [resolvable:$true] %s154_s29 }
  0x2b   : > { %v137_v2 = vsel %vm135_vm0, %v134_v0, %v136_v1  ;;  %s327_s30 = sshra.s32 %s155_s29, 4  ;;  %s333_s4 = scalar_lea.hbm %s519_s1, 16  ;;  %s328_s30 = int_to_ptr.hbm [resolvable:$true] %s327_s30 }
  0x2c   : > { %138 = vst [vmem:[%s133_s27] sm:$0xff] %v137_v2  ;;  %s329_s2 = scalar_lea.hbm %s328_s30, 8  ;;  %p334_p0 = scmp.lt.s32.totalorder %s328_s30, %s519_s1 }
  0x2d   : > { %p330_p6 = scmp.ne.s32.totalorder %s328_s30, %s329_s2  ;;  %p335_p1 = scmp.lt.s32.totalorder %s333_s4, %s329_s2 }
  0x2f   : > { %p331_p9 = pnand %p330_p6, %p441_p11  ;;  %p336_p3 = por %p335_p1, %p334_p0 }
  0x31   : > { %p332_p13 = pneg %p331_p9 }
  0x33   : > { %p337_p4 = pnand %p336_p3, %p332_p13 }
  0x35   : > { %340 = shalt.err (!%p337_p4)
}
  0x36   : > { %239 = dma.vmem_to_hbm [thread:$0]  (%p441_p11), %s153_s28, 128, %s155_s29, %s140_s17  }
  0x37 PF: > { %s166_s13 = sand.u32 1, %s367_s6   ;;  %p525_p7 = scmp.ge.s32.totalorder %s379_s9, 2 }
  0x38   : > { %s167_s14 = scalar_lea.sflag [#allocation4], %s166_s13 }
  0x39   : > { %p246_p5 = pnand %p525_p7, %p445_p12 }
  0x3b   : > { %p247_p8 = pneg %p246_p5 }
  0x3d   : > { %362 = dma.done.wait (%p247_p8), %s167_s14, 128  }
  0x3e   : > { %364 = vsyncadd (%p247_p8), %s167_s14, 4294967168  ;;  %p14_p10 = scmp.ge.s32.totalorder %s416_s12, 4   ;;  %s526_s6 = smov %s371_s7 }
  0x3f   : > { %s527_s7 = smov %s375_s8  ;;  %s528_s8 = smov %s428_s15 }
  0x40   : > { %s529_s9 = smov %s416_s12  ;;  %16 = sbr.rel (!%p14_p10) target bundleno = 5 (0x5), region = 69 }
  0x45   :  { %173 = vsyncpa [#allocation3], 1 }
  0x46   :  { %175 = vsyncpa [#allocation3 + $0x1], 1 }
  0x47   :  { %176 = vsyncpa [#allocation4], 1 }
  0x48   :  { %178 = vsyncpa [#allocation4 + $0x1], 1 }

</bundles_post_ra>
